<compile_context>
chip_gen: v6e
topology: v6e:2x2x1
jax: 0.10.0
libtpu: 0.0.40
codegen_flags: <defaults>
</compile_context>

<pallas_src>
import functools

import jax
import jax.numpy as jnp
from jax import lax
from jax.experimental import pallas as pl
from jax.experimental.pallas import tpu as pltpu

BN_EPS = 1e-5
# Contract dim 1 of both operands: A (m, k) x B (n, k) -> (m, n)  (i.e. A @ B^T).
_NT_DIMS = (((1,), (1,)), ((), ()))


# ---------------------------------------------------------------------------
# Kernels
# ---------------------------------------------------------------------------

def _stats_kernel(x_ref, w_ref, sum_ref, sumsq_ref, *, tm, hw_valid, need_mask):
    """Pass 1: 1x1-conv matmul for one spatial tile, accumulate channel sums."""
    i = pl.program_id(1)
    x = x_ref[0]                       # (TM, Cin)
    w = w_ref[...]                     # (Cout, Cin)
    z = lax.dot_general(x, w, _NT_DIMS,
                        preferred_element_type=jnp.float32)      # (TM, Cout)
    if need_mask:
        # Ragged last tile: rows past hw_valid hold garbage (partial DMA) and must
        # not pollute the batch statistics.  Mask before squaring so NaN garbage
        # cannot propagate.
        row = lax.broadcasted_iota(jnp.int32, z.shape, 0) + i * tm
        z = jnp.where(row < hw_valid, z, 0.0)
    s = jnp.sum(z, axis=0, keepdims=True)                        # (1, Cout)
    ss = jnp.sum(z * z, axis=0, keepdims=True)                   # (1, Cout)

    @pl.when(i == 0)
    def _():
        sum_ref[0] = s
        sumsq_ref[0] = ss

    @pl.when(i != 0)
    def _():
        sum_ref[0] += s
        sumsq_ref[0] += ss


def _apply_kernel(x_ref, w_ref, scale_ref, bias_ref, o_ref):
    """Pass 2: recompute matmul in (Cout, TM) orientation, fuse BN, store NCHW."""
    zt = lax.dot_general(w_ref[...], x_ref[0], _NT_DIMS,
                         preferred_element_type=jnp.float32)     # (Cout, TM)
    o_ref[0] = (zt * scale_ref[...] + bias_ref[...]).astype(o_ref.dtype)


def _fused_kernel(x_ref, w_ref, gamma_ref, beta_ref, o_ref, *, n_batch, m_rows):
    """Tiny-problem fast path: everything resident in VMEM, single kernel."""
    w = w_ref[...]                     # (Cout, Cin)
    cout = w.shape[0]
    s = jnp.zeros((cout, 1), jnp.float32)
    ss = jnp.zeros((cout, 1), jnp.float32)
    for n in range(n_batch):
        zt = lax.dot_general(w, x_ref[n], _NT_DIMS,
                             preferred_element_type=jnp.float32)  # (Cout, HW)
        s = s + jnp.sum(zt, axis=1, keepdims=True)
        ss = ss + jnp.sum(zt * zt, axis=1, keepdims=True)
    inv_m = 1.0 / m_rows
    mean = s * inv_m
    # TODO(synk): E[z^2]-E[z]^2 can cancel for large-mean activations; a shifted /
    # Welford accumulation would be safer if this ever feeds training.
    var = jnp.maximum(ss * inv_m - mean * mean, 0.0)
    scale = gamma_ref[...] * lax.rsqrt(var + BN_EPS)              # (Cout, 1)
    bias = beta_ref[...] - mean * scale
    for n in range(n_batch):
        zt = lax.dot_general(w, x_ref[n], _NT_DIMS,
                             preferred_element_type=jnp.float32)
        o_ref[n] = (zt * scale + bias).astype(o_ref.dtype)


# ---------------------------------------------------------------------------
# Sizing helpers
# ---------------------------------------------------------------------------

def _vmem_phys_bytes():
    try:
        cap = int(getattr(pltpu.get_tpu_info(), "vmem_capacity_bytes", 0) or 0)
        if cap > 0:
            return cap
    except Exception:
        pass
    return 64 << 20           # conservative (v7x-sized) fallback


def _two_pass_footprint(tm, cin, cout, xb, ob):
    # Pass 1: x tiles (x2 buffers) + weights (x2) + f32 z / z*z / mask temps + accs.
    p1 = (2 * tm * cin * xb + 2 * cout * cin * xb
          + 3 * tm * cout * 4 + 8 * cout * 4)
    # Pass 2: x tiles (x2) + weights (x2) + out tiles (x2) + f32 temps + scale/bias.
    p2 = (2 * tm * cin * xb + 2 * cout * cin * xb
          + 2 * cout * tm * ob + 2 * tm * cout * 4 + 8 * cout * 4)
    return max(p1, p2)


def _pick_tm(hw, cin, cout, xb, ob, budget, tm_max=1024):
    if hw <= 128:
        return hw                                   # full-extent block, always legal
    if hw <= tm_max and _two_pass_footprint(hw, cin, cout, xb, ob) <= budget:
        return hw                                   # one tile per image, no masking
    for cand in (1024, 512, 256, 128):              # 128-multiples: lane-dense stores
        if cand <= min(hw, tm_max) and _two_pass_footprint(cand, cin, cout, xb, ob) <= budget:
            return cand
    return 128


# ---------------------------------------------------------------------------
# Wrapper
# ---------------------------------------------------------------------------

def downsample_forward(x_nchw, conv_weight, gamma, beta, *, force_two_pass=False):
    """x_nchw: (N, Cin, H, W); conv_weight: (Cout, Cin, 1, 1); gamma/beta: (Cout,)."""
    N, Cin, H, W = x_nchw.shape
    Cout = conv_weight.shape[0]
    Ho, Wo = (H + 1) // 2, (W + 1) // 2
    HW = Ho * Wo
    M = N * HW

    x_dtype = x_nchw.dtype
    out_dtype = x_dtype
    xb = jnp.dtype(x_dtype).itemsize
    ob = jnp.dtype(out_dtype).itemsize

    phys = _vmem_phys_bytes()
    budget = (phys * 3) // 8          # tile budget: ~48 MiB on v5e/v6e, ~24 MiB on v7x
    vmem_limit = int(phys // 2)       # scoped VMEM request: 64 MiB / 32 MiB

    # k=1, s=2, p=0 conv reads only the even-index pixels: one fused XLA
    # slice+transpose+reshape builds the (N, Ho*Wo, Cin) pixel matrix.  No padding.
    # TODO(synk): with an NHWC producer this copy becomes a free reshape view and the
    # even-pixel selection could be expressed purely via index_maps.
    x3d = jnp.transpose(x_nchw[:, :, ::2, ::2], (0, 2, 3, 1)).reshape(N, HW, Cin)
    w_oc = conv_weight.reshape(Cout, Cin).astype(x_dtype)         # (Cout, Cin)
    gamma_col = gamma.astype(jnp.float32).reshape(Cout, 1)
    beta_col = beta.astype(jnp.float32).reshape(Cout, 1)

    fused_fp = (N * HW * Cin * xb + Cout * Cin * xb + N * Cout * HW * ob
                + 2 * HW * Cout * 4 + 16 * Cout * 4)
    use_fused = (not force_two_pass) and fused_fp <= (4 << 20)

    if use_fused:
        out3d = pl.pallas_call(
            functools.partial(_fused_kernel, n_batch=N, m_rows=float(M)),
            out_shape=jax.ShapeDtypeStruct((N, Cout, HW), out_dtype),
            compiler_params=pltpu.CompilerParams(vmem_limit_bytes=vmem_limit),
        )(x3d, w_oc, gamma_col, beta_col)
    else:
        TM = _pick_tm(HW, Cin, Cout, xb, ob, budget)
        n_tiles = pl.cdiv(HW, TM)
        need_mask = (HW % TM) != 0

        # Pass 1: stats only (no z store).  One accumulator row per batch element so
        # the batch axis can be "parallel" (v7x uses both TensorCores); the spatial
        # tile axis is "arbitrary" with a resident accumulator.
        sums, sumsqs = pl.pallas_call(
            functools.partial(_stats_kernel, tm=TM, hw_valid=HW, need_mask=need_mask),
            out_shape=(jax.ShapeDtypeStruct((N, 1, Cout), jnp.float32),
                       jax.ShapeDtypeStruct((N, 1, Cout), jnp.float32)),
            grid=(N, n_tiles),
            in_specs=[
                pl.BlockSpec((1, TM, Cin), lambda n, i: (n, i, 0)),
                pl.BlockSpec((Cout, Cin), lambda n, i: (0, 0)),
            ],
            out_specs=(
                pl.BlockSpec((1, 1, Cout), lambda n, i: (n, 0, 0)),
                pl.BlockSpec((1, 1, Cout), lambda n, i: (n, 0, 0)),
            ),
            compiler_params=pltpu.CompilerParams(
                dimension_semantics=("parallel", "arbitrary"),
                vmem_limit_bytes=vmem_limit),
        )(x3d, w_oc)

        # Finalize BatchNorm batch statistics (tiny per-channel math in XLA).
        gamma_f = gamma.astype(jnp.float32)
        beta_f = beta.astype(jnp.float32)
        mean = jnp.sum(sums, axis=(0, 1)) / M                       # (Cout,)
        var = jnp.maximum(jnp.sum(sumsqs, axis=(0, 1)) / M - mean * mean, 0.0)
        inv_std = lax.rsqrt(var + BN_EPS)
        scale_v = gamma_f * inv_std
        bias_v = beta_f - mean * scale_v
        scale_col = scale_v.reshape(Cout, 1)
        bias_col = bias_v.reshape(Cout, 1)

        # Pass 2: recompute the 1x1 matmul in (Cout, TM) orientation, fuse the BN
        # affine, and store straight into the NCHW output layout (no extra
        # transpose pass; ragged last tile's OOB writes are dropped by Pallas).
        out3d = pl.pallas_call(
            _apply_kernel,
            out_shape=jax.ShapeDtypeStruct((N, Cout, HW), out_dtype),
            grid=(N, n_tiles),
            in_specs=[
                pl.BlockSpec((1, TM, Cin), lambda n, i: (n, i, 0)),
                pl.BlockSpec((Cout, Cin), lambda n, i: (0, 0)),
                pl.BlockSpec((Cout, 1), lambda n, i: (0, 0)),
                pl.BlockSpec((Cout, 1), lambda n, i: (0, 0)),
            ],
            out_specs=pl.BlockSpec((1, Cout, TM), lambda n, i: (n, 0, i)),
            compiler_params=pltpu.CompilerParams(
                dimension_semantics=("parallel", "parallel"),
                vmem_limit_bytes=vmem_limit),
        )(x3d, w_oc, scale_col, bias_col)

    return out3d.reshape(N, Cout, Ho, Wo)


# ---------------------------------------------------------------------------
# Pure-JAX reference (torch Conv2d(k=1,s=2,bias=False) + BatchNorm2d(train))
# ---------------------------------------------------------------------------

def _reference(x_nchw, conv_weight, gamma, beta):
    xs = x_nchw[:, :, ::2, ::2].astype(jnp.float32)
    w = conv_weight.reshape(conv_weight.shape[0], -1).astype(jnp.float32)
    z = jnp.einsum("oc,nchw->nohw", w, xs)
    mean = jnp.mean(z, axis=(0, 2, 3), keepdims=True)
    var = jnp.mean((z - mean) ** 2, axis=(0, 2, 3), keepdims=True)
    zn = (z - mean) * lax.rsqrt(var + BN_EPS)
    return zn * gamma.reshape(1, -1, 1, 1) + beta.reshape(1, -1, 1, 1)


if __name__ == "__main__":
    key = jax.random.PRNGKey(0)
    k_x, k_w, k_g, k_b, k_x2 = jax.random.split(key, 5)

    N, Cin, H, W = 2, 4, 16, 16
    Cout = 8

    x = jax.random.normal(k_x, (N, Cin, H, W), dtype=jnp.float32)
    conv_weight = jax.random.normal(k_w, (Cout, Cin, 1, 1), dtype=jnp.float32) * 0.1
    gamma = 1.0 + 0.1 * jax.random.normal(k_g, (Cout,), dtype=jnp.float32)
    beta = 0.1 * jax.random.normal(k_b, (Cout,), dtype=jnp.float32)

    # Small shape: exercises the fused single-kernel fast path.
    out = jax.block_until_ready(downsample_forward(x, conv_weight, gamma, beta))
    ref = _reference(x, conv_weight, gamma, beta)
    assert out.shape == (N, Cout, H // 2, W // 2), out.shape
    assert jnp.allclose(out, ref, atol=1e-4, rtol=1e-4), "fused path mismatch"

    # Larger shape forced through the two-pass path: multiple spatial tiles per
    # image plus a ragged last tile, exercising accumulation and the row mask.
    N2, H2, W2 = 2, 126, 126
    x2 = jax.random.normal(k_x2, (N2, Cin, H2, W2), dtype=jnp.float32)
    out2 = jax.block_until_ready(
        downsample_forward(x2, conv_weight, gamma, beta, force_two_pass=True))
    ref2 = _reference(x2, conv_weight, gamma, beta)
    assert out2.shape == (N2, Cout, 63, 63), out2.shape
    assert jnp.allclose(out2, ref2, atol=5e-4, rtol=5e-4), "two-pass path mismatch"

    print("KERNEL_OK")
</pallas_src>

<mosaic_0001>
module attributes {stable_mosaic.version = 11 : i64} {
  func.func @_fused_kernel(%arg0: memref<2x64x4xf32, #tpu.memory_space<vmem>>, %arg1: memref<8x4xf32, #tpu.memory_space<vmem>>, %arg2: memref<8x1xf32, #tpu.memory_space<vmem>>, %arg3: memref<8x1xf32, #tpu.memory_space<vmem>>, %arg4: memref<2x8x64xf32, #tpu.memory_space<vmem>>) attributes {dimension_semantics = [], scalar_prefetch = 0 : i64, scratch_operands = 0 : i64, tpu.core_type = #tpu.core_type<tc>} {
    %c0 = arith.constant 0 : index
    %c0_0 = arith.constant 0 : index
    %0 = vector.load %arg1[%c0, %c0_0] : memref<8x4xf32, #tpu.memory_space<vmem>>, vector<8x4xf32>
    %cst = arith.constant 0.000000e+00 : f32
    %1 = vector.broadcast %cst : f32 to vector<8x1xf32>
    %cst_1 = arith.constant 0.000000e+00 : f32
    %2 = vector.broadcast %cst_1 : f32 to vector<8x1xf32>
    %c0_2 = arith.constant 0 : index
    %c0_3 = arith.constant 0 : index
    %c0_4 = arith.constant 0 : index
    %3 = vector.load %arg0[%c0_2, %c0_3, %c0_4] : memref<2x64x4xf32, #tpu.memory_space<vmem>>, vector<1x64x4xf32>
    %4 = vector.shape_cast %3 : vector<1x64x4xf32> to vector<64x4xf32>
    %cst_5 = arith.constant dense<0.000000e+00> : vector<8x64xf32>
    %5 = tpu.matmul %0, %4, %cst_5 {dimension_numbers = #tpu.dot_dimension_numbers<[1], [1], [0], [0], [0, 0, 1, 0], [], []>} : vector<8x4xf32>, vector<64x4xf32>, vector<8x64xf32> -> vector<8x64xf32>
    %cst_6 = arith.constant dense<0.000000e+00> : vector<8xf32>
    %6 = vector.multi_reduction <add>, %5, %cst_6 [1] : vector<8x64xf32> to vector<8xf32>
    %7 = vector.shape_cast %6 : vector<8xf32> to vector<8x1xf32>
    %8 = arith.addf %1, %7 : vector<8x1xf32>
    %9 = arith.mulf %5, %5 : vector<8x64xf32>
    %cst_7 = arith.constant dense<0.000000e+00> : vector<8xf32>
    %10 = vector.multi_reduction <add>, %9, %cst_7 [1] : vector<8x64xf32> to vector<8xf32>
    %11 = vector.shape_cast %10 : vector<8xf32> to vector<8x1xf32>
    %12 = arith.addf %2, %11 : vector<8x1xf32>
    %c1 = arith.constant 1 : index
    %c0_8 = arith.constant 0 : index
    %c0_9 = arith.constant 0 : index
    %13 = vector.load %arg0[%c1, %c0_8, %c0_9] : memref<2x64x4xf32, #tpu.memory_space<vmem>>, vector<1x64x4xf32>
    %14 = vector.shape_cast %13 : vector<1x64x4xf32> to vector<64x4xf32>
    %cst_10 = arith.constant dense<0.000000e+00> : vector<8x64xf32>
    %15 = tpu.matmul %0, %14, %cst_10 {dimension_numbers = #tpu.dot_dimension_numbers<[1], [1], [0], [0], [0, 0, 1, 0], [], []>} : vector<8x4xf32>, vector<64x4xf32>, vector<8x64xf32> -> vector<8x64xf32>
    %cst_11 = arith.constant dense<0.000000e+00> : vector<8xf32>
    %16 = vector.multi_reduction <add>, %15, %cst_11 [1] : vector<8x64xf32> to vector<8xf32>
    %17 = vector.shape_cast %16 : vector<8xf32> to vector<8x1xf32>
    %18 = arith.addf %8, %17 : vector<8x1xf32>
    %19 = arith.mulf %15, %15 : vector<8x64xf32>
    %cst_12 = arith.constant dense<0.000000e+00> : vector<8xf32>
    %20 = vector.multi_reduction <add>, %19, %cst_12 [1] : vector<8x64xf32> to vector<8xf32>
    %21 = vector.shape_cast %20 : vector<8xf32> to vector<8x1xf32>
    %22 = arith.addf %12, %21 : vector<8x1xf32>
    %cst_13 = arith.constant 7.812500e-03 : f32
    %23 = vector.broadcast %cst_13 : f32 to vector<8x1xf32>
    %24 = arith.mulf %18, %23 : vector<8x1xf32>
    %cst_14 = arith.constant 7.812500e-03 : f32
    %25 = vector.broadcast %cst_14 : f32 to vector<8x1xf32>
    %26 = arith.mulf %22, %25 : vector<8x1xf32>
    %27 = arith.mulf %24, %24 : vector<8x1xf32>
    %28 = arith.subf %26, %27 : vector<8x1xf32>
    %cst_15 = arith.constant 0.000000e+00 : f32
    %29 = vector.broadcast %cst_15 : f32 to vector<8x1xf32>
    %30 = arith.maximumf %28, %29 : vector<8x1xf32>
    %c0_16 = arith.constant 0 : index
    %c0_17 = arith.constant 0 : index
    %31 = vector.load %arg2[%c0_16, %c0_17] : memref<8x1xf32, #tpu.memory_space<vmem>>, vector<8x1xf32>
    %cst_18 = arith.constant 9.99999974E-6 : f32
    %32 = vector.broadcast %cst_18 : f32 to vector<8x1xf32>
    %33 = arith.addf %30, %32 : vector<8x1xf32>
    %34 = math.rsqrt %33 : vector<8x1xf32>
    %35 = arith.mulf %31, %34 : vector<8x1xf32>
    %c0_19 = arith.constant 0 : index
    %c0_20 = arith.constant 0 : index
    %36 = vector.load %arg3[%c0_19, %c0_20] : memref<8x1xf32, #tpu.memory_space<vmem>>, vector<8x1xf32>
    %37 = arith.mulf %24, %35 : vector<8x1xf32>
    %38 = arith.subf %36, %37 : vector<8x1xf32>
    %c0_21 = arith.constant 0 : index
    %c0_22 = arith.constant 0 : index
    %c0_23 = arith.constant 0 : index
    %39 = vector.load %arg0[%c0_21, %c0_22, %c0_23] : memref<2x64x4xf32, #tpu.memory_space<vmem>>, vector<1x64x4xf32>
    %40 = vector.shape_cast %39 : vector<1x64x4xf32> to vector<64x4xf32>
    %cst_24 = arith.constant dense<0.000000e+00> : vector<8x64xf32>
    %41 = tpu.matmul %0, %40, %cst_24 {dimension_numbers = #tpu.dot_dimension_numbers<[1], [1], [0], [0], [0, 0, 1, 0], [], []>} : vector<8x4xf32>, vector<64x4xf32>, vector<8x64xf32> -> vector<8x64xf32>
    %42 = vector.broadcast %35 : vector<8x1xf32> to vector<8x64xf32>
    %43 = arith.mulf %41, %42 : vector<8x64xf32>
    %44 = vector.broadcast %38 : vector<8x1xf32> to vector<8x64xf32>
    %45 = arith.addf %43, %44 : vector<8x64xf32>
    %c0_25 = arith.constant 0 : index
    %c0_26 = arith.constant 0 : index
    %c0_27 = arith.constant 0 : index
    %46 = vector.load %arg4[%c0_25, %c0_26, %c0_27] : memref<2x8x64xf32, #tpu.memory_space<vmem>>, vector<1x8x64xf32>
    %47 = vector.shape_cast %46 : vector<1x8x64xf32> to vector<8x64xf32>
    %48 = vector.shape_cast %45 : vector<8x64xf32> to vector<1x8x64xf32>
    tpu.vector_store %arg4[%c0_25, %c0_26, %c0_27], %48 {strides = array<i32>} : memref<2x8x64xf32, #tpu.memory_space<vmem>>, vector<1x8x64xf32>,
    %c1_28 = arith.constant 1 : index
    %c0_29 = arith.constant 0 : index
    %c0_30 = arith.constant 0 : index
    %49 = vector.load %arg0[%c1_28, %c0_29, %c0_30] : memref<2x64x4xf32, #tpu.memory_space<vmem>>, vector<1x64x4xf32>
    %50 = vector.shape_cast %49 : vector<1x64x4xf32> to vector<64x4xf32>
    %cst_31 = arith.constant dense<0.000000e+00> : vector<8x64xf32>
    %51 = tpu.matmul %0, %50, %cst_31 {dimension_numbers = #tpu.dot_dimension_numbers<[1], [1], [0], [0], [0, 0, 1, 0], [], []>} : vector<8x4xf32>, vector<64x4xf32>, vector<8x64xf32> -> vector<8x64xf32>
    %52 = vector.broadcast %35 : vector<8x1xf32> to vector<8x64xf32>
    %53 = arith.mulf %51, %52 : vector<8x64xf32>
    %54 = vector.broadcast %38 : vector<8x1xf32> to vector<8x64xf32>
    %55 = arith.addf %53, %54 : vector<8x64xf32>
    %c1_32 = arith.constant 1 : index
    %c0_33 = arith.constant 0 : index
    %c0_34 = arith.constant 0 : index
    %56 = vector.load %arg4[%c1_32, %c0_33, %c0_34] : memref<2x8x64xf32, #tpu.memory_space<vmem>>, vector<1x8x64xf32>
    %57 = vector.shape_cast %56 : vector<1x8x64xf32> to vector<8x64xf32>
    %58 = vector.shape_cast %55 : vector<8x64xf32> to vector<1x8x64xf32>
    tpu.vector_store %arg4[%c1_32, %c0_33, %c0_34], %58 {strides = array<i32>} : memref<2x8x64xf32, #tpu.memory_space<vmem>>, vector<1x8x64xf32>,
    return
  }
}

</mosaic_0001>

<bundles_post_ra>
// kernel: tpu_custom_call.1
= control target key start
LH: loop header
LB: loop body
LE: loop exit
PB: predicated region body
PF: predicated region fallthrough
CT: control target
= control target key end

     0   :  { %vm27_vm0 = vcmask 31744   ;;  %v553_v2 = vmov 0.0   ;;  %vm554_vm1 = vmmov 0   ;;  %s707_s0 = inlined_call_operand.vmem [shape: f32[2,64,4], index: 0, kind: input, shape index: {}]   ;;  %s708_s1 = inlined_call_operand.vmem [shape: f32[8,4], index: 1, kind: input, shape index: {}]   ;;  %s709_s2 = inlined_call_operand.vmem [shape: f32[8,1], index: 2, kind: input, shape index: {}]   ;;  %s710_s3 = inlined_call_operand.vmem [shape: f32[8,1], index: 3, kind: input, shape index: {}]   ;;  %s711_s4 = inlined_call_operand.hbm [shape: f32[2,8,64], index: 4, kind: output, shape index: {}]  }
   0x1   :  { %v26_v0 = vld [vmem:[%s707_s0 + $0x38] sm:$0xff]  ;;  %464 = vmatprep.subr.mxu0 %v553_v2  ;;  %483 = vmatprep.subr.mxu1 %v553_v2  ;;  %v25_v3 = vld [vmem:[%s707_s0 + $0x30] sm:$0xff] }
   0x2   :  { %v410_v1 = vld [vmem:[%s707_s0 + $0x78] sm:$0xff]  ;;  %465 = vmatpush3.xpose.msk.msra.mxu0 %vm27_vm0, %v26_v0  ;;  %v409_v4 = vld [vmem:[%s707_s0 + $0x70] sm:$0xff]  ;;  %480 = vmatprep.mubr.msk.f32.mxu0 %vm554_vm1, %v553_v2 }
   0x3   :  { %484 = vmatpush3.xpose.msk.msra.mxu1 %vm27_vm0, %v410_v1  ;;  %466 = vmatprep.subr.mxu0 %v553_v2 }
   0x4   :  { %485 = vmatprep.subr.mxu1 %v553_v2  ;;  %499 = vmatprep.mubr.msk.f32.mxu1 %vm554_vm1, %v553_v2 }
   0x5   :  { %9 = vsyncpa [#allocation3], 0  ;;  %v24_v5 = vld [vmem:[%s707_s0 + $0x28] sm:$0xff]  ;;  %v23_v7 = vld [vmem:[%s707_s0 + $0x20] sm:$0xff]  ;;  %vm125_vm2 = vcmask 523264   ;;  %v555_v28 = vmov 0  }
   0x6   :  { %467 = vmatpush3.xpose.msk.msra.mxu0 %vm27_vm0, %v25_v3  ;;  %v408_v6 = vld [vmem:[%s707_s0 + $0x68] sm:$0xff]  ;;  %v407_v8 = vld [vmem:[%s707_s0 + $0x60] sm:$0xff]  ;;  %v22_v9 = vld [vmem:[%s707_s0 + $0x18] sm:$0xff]  ;;  %527 = vset.pattern.permute.xlu0 %v555_v28  ;;  %s556_s25 = smov [#allocation2]  }
   0x7   :  { %486 = vmatpush3.xpose.msk.msra.mxu1 %vm27_vm0, %v409_v4  ;;  %468 = vmatprep.subr.mxu0 %v553_v2  ;;  %v406_v10 = vld [vmem:[%s707_s0 + $0x58] sm:$0xff]  ;;  %v21_v11 = vld [vmem:[%s707_s0 + $0x10] sm:$0xff]  ;;  %v20_v13 = vld [vmem:[%s707_s0 + $0x8] sm:$0xff]  ;;  %s383_s26 = sshll.u32 %s556_s25, 4  ;;  %s384_s26 = int_to_ptr.vmem [resolvable:$true] %s383_s26 }
   0x8   :  { %487 = vmatprep.subr.mxu1 %v553_v2  ;;  %v405_v12 = vld [vmem:[%s707_s0 + $0x50] sm:$0xff]  ;;  %v404_v14 = vld [vmem:[%s707_s0 + $0x48] sm:$0xff]  ;;  %v19_v15 = vld [vmem:[%s707_s0] sm:$0xff]  ;;  %528 = vset.pattern.permute.xlu1 %v555_v28  ;;  %p536_p1 = scmp.lt.s32.totalorder %s384_s26, %s384_s26 }
   0x9   :  { %v403_v16 = vld [vmem:[%s707_s0 + $0x40] sm:$0xff] }
   0xa   :  { %469 = vmatpush3.xpose.msk.msra.mxu0 %vm27_vm0, %v24_v5  ;;  %v18_v17 = vld [vmem:[%s708_s1] sm:$0xff] }
   0xb   :  { %488 = vmatpush3.xpose.msk.msra.mxu1 %vm27_vm0, %v408_v6  ;;  %470 = vmatprep.subr.mxu0 %v553_v2  ;;  %v252_v41 = vld [vmem:[%s709_s2] sm:$0xff]  ;;  %s531_s2 = scalar_lea.vmem %s384_s26, 256 }
   0xc   :  { %489 = vmatprep.subr.mxu1 %v553_v2  ;;  %v256_v46 = vld [vmem:[%s710_s3] sm:$0xff]  ;;  %p532_p0 = scmp.ne.s32.totalorder %s384_s26, %s531_s2  ;;  %p537_p2 = scmp.lt.s32.totalorder %s531_s2, %s531_s2 }
   0xe   :  { %471 = vmatpush3.xpose.msk.msra.mxu0 %vm27_vm0, %v23_v7  ;;  %p538_p3 = por %p537_p2, %p536_p1 }
   0xf   :  { %490 = vmatpush3.xpose.msk.msra.mxu1 %vm27_vm0, %v407_v8  ;;  %472 = vmatprep.subr.mxu0 %v553_v2 }
  0x10   :  { %491 = vmatprep.subr.mxu1 %v553_v2  ;;  %p539_p4 = pnand %p538_p3, %p532_p0 }
  0x12   :  { %473 = vmatpush3.xpose.msk.msra.mxu0 %vm27_vm0, %v22_v9 }
  0x13   :  { %492 = vmatpush3.xpose.msk.msra.mxu1 %vm27_vm0, %v406_v10  ;;  %474 = vmatprep.subr.mxu0 %v553_v2 }
  0x14   :  { %493 = vmatprep.subr.mxu1 %v553_v2 }
  0x16   :  { %475 = vmatpush3.xpose.msk.msra.mxu0 %vm27_vm0, %v21_v11 }
  0x17   :  { %494 = vmatpush3.xpose.msk.msra.mxu1 %vm27_vm0, %v405_v12  ;;  %476 = vmatprep.subr.mxu0 %v553_v2 }
  0x18   :  { %495 = vmatprep.subr.mxu1 %v553_v2 }
  0x1a   :  { %477 = vmatpush3.xpose.msk.msra.mxu0 %vm27_vm0, %v20_v13 }
  0x1b   :  { %496 = vmatpush3.xpose.msk.msra.mxu1 %vm27_vm0, %v404_v14  ;;  %478 = vmatprep.subr.mxu0 %v553_v2 }
  0x1c   :  { %497 = vmatprep.subr.mxu1 %v553_v2 }
  0x1e   :  { %479 = vmatpush3.xpose.msk.msra.mxu0 %vm27_vm0, %v19_v15 }
  0x1f   :  { %498 = vmatpush3.xpose.msk.msra.mxu1 %vm27_vm0, %v403_v16  ;;  %502 = vmatprep.subr.mxu0 %v553_v2 }
  0x21   :  { %481 = vmatmul.mubr.msk.f32.vlgmr.msra.gmra.mxu0 %vm27_vm0, %v18_v17 }
  0x22   :  { %500 = vmatmul.mubr.msk.f32.vlgmr.msra.gmra.mxu1 %vm27_vm0, %v18_v17  ;;  %503 = vmatpush3.xpose.msk.msra.mxu0 %vm27_vm0, %v410_v1 }
  0x23   :  { %518 = vmatprep.mubr.msk.f32.mxu0 %vm554_vm1, %v553_v2  ;;  %504 = vmatprep.subr.mxu0 %v553_v2 }
  0x26   :  { %505 = vmatpush3.xpose.msk.msra.mxu0 %vm27_vm0, %v409_v4 }
  0x27   :  { %506 = vmatprep.subr.mxu0 %v553_v2 }
  0x2a   :  { %507 = vmatpush3.xpose.msk.msra.mxu0 %vm27_vm0, %v408_v6 }
  0x2b   :  { %508 = vmatprep.subr.mxu0 %v553_v2 }
  0x2e   :  { %509 = vmatpush3.xpose.msk.msra.mxu0 %vm27_vm0, %v407_v8 }
  0x2f   :  { %510 = vmatprep.subr.mxu0 %v553_v2 }
  0x32   :  { %511 = vmatpush3.xpose.msk.msra.mxu0 %vm27_vm0, %v406_v10 }
  0x33   :  { %512 = vmatprep.subr.mxu0 %v553_v2 }
  0x36   :  { %513 = vmatpush3.xpose.msk.msra.mxu0 %vm27_vm0, %v405_v12 }
  0x37   :  { %514 = vmatprep.subr.mxu0 %v553_v2 }
  0x3a   :  { %515 = vmatpush3.xpose.msk.msra.mxu0 %vm27_vm0, %v404_v14 }
  0x3b   :  { %516 = vmatprep.subr.mxu0 %v553_v2 }
  0x3e   :  { %517 = vmatpush3.xpose.msk.msra.mxu0 %vm27_vm0, %v403_v16 }
  0x41   :  { %519 = vmatmul.mubr.msk.f32.vlgmr.msra.gmra.mxu0 %vm27_vm0, %v18_v17 }
  0xe1   :  { %v121_v18 = vpop.f32.mrf.mxu0 }
  0xe2   :  { %v234_v19 = vpop.f32.mrf.mxu1  ;;  %v126_v21 = vsel %vm125_vm2, %v121_v18, 0.0  ;;  %v130_v22 = vmul.f32 %v121_v18, %v121_v18 }
  0xe3   :  { %v242_v20 = vmul.f32 %v234_v19, %v234_v19  ;;  %127 = vadd.xlane.f32.xlu0 %v126_v21  ;;  %v482_v23 = vpop.f32.mrf.mxu0  ;;  %v238_v26 = vsel %vm125_vm2, %v234_v19, 0.0 }
  0xe4   :  { %v501_v24 = vpop.f32.mrf.mxu1  ;;  %v131_v25 = vsel %vm125_vm2, %v130_v22, 0.0 }
  0xe5   :  { %132 = vadd.xlane.f32.xlu1 %v131_v25  ;;  %v243_v27 = vsel %vm125_vm2, %v242_v20, 0.0 }
  0xe7   :  { %239 = vadd.xlane.f32.xlu0 %v238_v26 }
  0xe9   :  { %244 = vadd.xlane.f32.xlu1 %v243_v27 }
 0x101   :  { %v370_v42 = vpop.f32.mrf.mxu0 }
 0x103   :  { %v520_v44 = vpop.f32.mrf.mxu0 }
 0x16c   :  { %v128_v29 = vpop.xlane.xlu0 %127 }
 0x16e   :  { %v133_v30 = vpop.xlane.xlu1 %132 }
 0x170   :  { %v240_v31 = vpop.xlane.xlu0 %239 }
 0x171   :  { %v241_v32 = vadd.f32 %v240_v31, %v128_v29 }
 0x172   :  { %v245_v33 = vpop.xlane.xlu1 %244 }
 0x173   :  { %v247_v34 = vmul.f32 0.0078125, %v241_v32  ;;  %v246_v35 = vadd.f32 %v245_v33, %v133_v30 }
 0x175   :  { %v249_v36 = vmul.f32 %v247_v34, %v247_v34  ;;  %v248_v37 = vmul.f32 0.0078125, %v246_v35 }
 0x177   :  { %v250_v38 = vsub.f32 %v248_v37, %v249_v36 }
 0x179   :  { %v251_v39 = vmax.f32 %v250_v38, 0.0 }
 0x17b   :  { %v253_v40 = vadd.f32 1e-05, %v251_v39 }
 0x17d   :  { %529 = vrsqrt.f32 %v253_v40 }
 0x18a   :  { %v530_v43 = vpop.eup %529 }
 0x18b   :  { %v255_v45 = vmul.f32 %v530_v43, %v252_v41 }
 0x18d   :  { %261 = vperm.xlu0 %527, %v255_v45   ;;  %v257_v47 = vmul.f32 %v255_v45, %v247_v34 }
 0x18f   :  { %v258_v48 = vsub.f32 %v256_v46, %v257_v47 }
 0x191   :  { %267 = vperm.xlu1 %528, %v258_v48  }
 0x208   :  { %v262_v49 = vpop.permute.xlu0 %261 }
 0x209   :  { %v264_v50 = vmul.f32 %v262_v49, %v121_v18  ;;  %v374_v51 = vmul.f32 %v370_v42, %v262_v49 }
 0x20c   :  { %v268_v52 = vpop.permute.xlu1 %267 }
 0x20d   :  { %v270_v53 = vadd.f32 %v268_v52, %v264_v50  ;;  %v375_v54 = vadd.f32 %v374_v51, %v268_v52 }
 0x20f   :  { %271 = vst.msk [vmem:[#allocation2] sm:$0xff] %vm125_vm2, %v270_v53  ;;  %377 = vst.msk [vmem:[#allocation2 + $0x8] sm:$0xff] %vm125_vm2, %v375_v54 }
 0x210   :  { %542 = shalt.err (!%p539_p4)
}
 0x211   :  { %s557_s3 = smov 128   ;;  %s558_s27 = smov 8  }
 0x212   :  { %389 = dma.vmem_to_hbm [thread:$0]  %s384_s26, 256, %s711_s4, [#allocation3], %s557_s3, %s557_s3, %s558_s27  }
 0x213   :  { %551 = dma.done.wait [#allocation3], 256  }
 0x214   :  { %552 = vsyncadd [#allocation3], 4294967040 }
 0x215   :  { %393 = vsyncpa [#allocation3], 1 }

</bundles_post_ra>
